<compile_context>
chip_gen: v6e
topology: v6e:2x2x1
jax: 0.10.0
libtpu: 0.0.40
codegen_flags: <defaults>
</compile_context>

<pallas_src>
import functools

import jax
import jax.numpy as jnp
from jax import lax
from jax.experimental import pallas as pl
from jax.experimental.pallas import tpu as pltpu


def _round_up(x: int, m: int) -> int:
    return ((x + m - 1) // m) * m


def _ffn_kernel(x_ref, gamma_ref, beta_ref, w1_ref, b1_ref, w2_ref, b2_ref,
                o_ref, xn_ref, acc_ref, *, eps: float, d_true: int):
    """One (row-tile i, hidden-chunk k) grid step.

    i axis ("parallel"): independent row tiles.
    k axis ("arbitrary"): streams W1/W2 hidden chunks; acc_ref accumulates y.
    """
    k = pl.program_id(1)

    # --- LayerNorm (f32 stats) once per row tile, cached in VMEM scratch ---
    @pl.when(k == 0)
    def _():
        x = x_ref[...].astype(jnp.float32)
        dp = x.shape[-1]
        inv_d = 1.0 / float(d_true)
        mean = jnp.sum(x, axis=-1, keepdims=True) * inv_d
        centered = x - mean
        if dp != d_true:
            # Mask the zero-padded feature columns out of the variance.
            col = lax.broadcasted_iota(jnp.int32, (1, dp), 1)
            centered = jnp.where(col < d_true, centered, 0.0)
        var = jnp.sum(centered * centered, axis=-1, keepdims=True) * inv_d
        xn = centered * lax.rsqrt(var + eps)
        xn = xn * gamma_ref[...].astype(jnp.float32) + beta_ref[...].astype(jnp.float32)
        xn_ref[...] = xn.astype(xn_ref.dtype)          # cached in compute dtype (bf16)
        acc_ref[...] = jnp.zeros_like(acc_ref)

    # --- Linear1 chunk (MXU, bf16 x bf16 -> f32 acc) + Swish ---
    h = jnp.dot(xn_ref[...], w1_ref[...], preferred_element_type=jnp.float32)
    h = h + b1_ref[...].astype(jnp.float32)
    h = h * jax.nn.sigmoid(h)                          # Swish; EUP handles the exp
    # (Dropout = identity at inference.)

    # --- Linear2 chunk, accumulate into f32 scratch ---
    acc_ref[...] += jnp.dot(h.astype(w2_ref.dtype), w2_ref[...],
                            preferred_element_type=jnp.float32)

    # --- Finalize on the last hidden chunk ---
    @pl.when(k == pl.num_programs(1) - 1)
    def _():
        y = acc_ref[...] + b2_ref[...].astype(jnp.float32)
        # (Dropout = identity at inference.)
        o_ref[...] = y.astype(o_ref.dtype)


def feed_forward_module(x, gamma, beta, w1, b1, w2, b2, *, eps: float = 1e-5,
                        tile_rows: int = 512, tile_hidden: int = 512,
                        compute_dtype=jnp.bfloat16):
    """x: (batch, seq, D) -> (batch, seq, D)."""
    batch, seq, d = x.shape
    hidden = w1.shape[1]
    n = batch * seq

    # Lane-dense feature / hidden-chunk widths (multiples of 128).
    dp = _round_up(d, 128)
    tk = min(_round_up(hidden, 128), max(128, (tile_hidden // 128) * 128))
    hp = _round_up(hidden, tk)                # multiple of tk (and of 128)
    grid_k = hp // tk

    # Row tiling: no row padding -- the grid handles a partial tail tile.
    row_align = 8 if x.dtype.itemsize >= 4 else 16
    if n >= row_align:
        tm = max(row_align, (min(tile_rows, n) // row_align) * row_align)
    else:
        tm = n                                # block == full dim, allowed
    grid_rows = pl.cdiv(n, tm)
    # v7x has 2 TensorCores: make sure the "parallel" axis has >= 2 tiles.
    if grid_rows < 2 and n >= 2 * row_align:
        tm = _round_up(pl.cdiv(n, 2), row_align)
        grid_rows = pl.cdiv(n, tm)

    # Activations: pad features only (zero columns), never rows.
    x2d = x.reshape(n, d)
    if dp != d:
        x2d = jnp.pad(x2d, ((0, 0), (0, dp - d)))

    def pad_row(v, target):
        v = v.reshape(1, -1)
        if v.shape[1] != target:
            v = jnp.pad(v, ((0, 0), (0, target - v.shape[1])))
        return v

    gamma2d = pad_row(gamma, dp)
    beta2d = pad_row(beta, dp)
    b1_2d = pad_row(b1, hp)
    b2_2d = pad_row(b2, dp)

    # Weights: bf16 (compute_dtype) for the MXU, zero-padded to (dp, hp)/(hp, dp).
    w1p = w1.astype(compute_dtype)
    if w1p.shape != (dp, hp):
        w1p = jnp.pad(w1p, ((0, dp - d), (0, hp - hidden)))
    w2p = w2.astype(compute_dtype)
    if w2p.shape != (hp, dp):
        w2p = jnp.pad(w2p, ((0, hp - hidden), (0, dp - d)))

    # VMEM budget: double-buffered x/out tiles + W1/W2 chunks, scratches, headroom.
    x_bytes = x.dtype.itemsize
    c_bytes = jnp.dtype(compute_dtype).itemsize
    needed = (2 * tm * dp * x_bytes            # input tile (double-buffered)
              + 2 * tm * dp * x_bytes          # output tile (double-buffered)
              + 2 * dp * tk * c_bytes          # W1 chunk (double-buffered)
              + 2 * tk * dp * c_bytes          # W2 chunk (double-buffered)
              + 2 * hp * 4 + 6 * dp * 4        # biases / gamma / beta
              + tm * dp * c_bytes              # xn scratch
              + tm * dp * 4                    # f32 accumulator scratch
              + tm * tk * 4)                   # (tm, tk) intermediate headroom
    try:
        vmem_cap = int(pltpu.get_tpu_info().vmem_capacity_bytes)
    except Exception:
        vmem_cap = 64 * 1024 * 1024            # conservative (v7x per-TC)
    vmem_limit = int(min((vmem_cap * 4) // 5, max(2 * needed, 32 * 1024 * 1024)))

    out = pl.pallas_call(
        functools.partial(_ffn_kernel, eps=eps, d_true=d),
        out_shape=jax.ShapeDtypeStruct((n, dp), x.dtype),
        grid_spec=pltpu.PrefetchScalarGridSpec(
            num_scalar_prefetch=0,
            grid=(grid_rows, grid_k),
            in_specs=[
                pl.BlockSpec((tm, dp), lambda i, k: (i, 0)),   # x tile
                pl.BlockSpec((1, dp), lambda i, k: (0, 0)),    # gamma (tiny, const)
                pl.BlockSpec((1, dp), lambda i, k: (0, 0)),    # beta  (tiny, const)
                pl.BlockSpec((dp, tk), lambda i, k: (0, k)),   # W1 chunk (streamed)
                pl.BlockSpec((1, tk), lambda i, k: (0, k)),    # b1 chunk
                pl.BlockSpec((tk, dp), lambda i, k: (k, 0)),   # W2 chunk (streamed)
                pl.BlockSpec((1, dp), lambda i, k: (0, 0)),    # b2 (tiny, const)
            ],
            out_specs=pl.BlockSpec((tm, dp), lambda i, k: (i, 0)),
            scratch_shapes=[
                pltpu.VMEM((tm, dp), compute_dtype),   # cached normalized activations
                pltpu.VMEM((tm, dp), jnp.float32),     # f32 output accumulator
            ],
        ),
        compiler_params=pltpu.CompilerParams(
            dimension_semantics=("parallel", "arbitrary"),
            vmem_limit_bytes=vmem_limit,
        ),
    )(x2d, gamma2d, beta2d, w1p, b1_2d, w2p, b2_2d)

    return out[:, :d].reshape(batch, seq, d)


def _reference(x, gamma, beta, w1, b1, w2, b2, eps=1e-5,
               compute_dtype=jnp.float32):
    xf = x.astype(jnp.float32)
    mean = jnp.mean(xf, axis=-1, keepdims=True)
    var = jnp.mean((xf - mean) ** 2, axis=-1, keepdims=True)
    xn = (xf - mean) * lax.rsqrt(var + eps) * gamma + beta
    h = jnp.dot(xn.astype(compute_dtype), w1.astype(compute_dtype),
                preferred_element_type=jnp.float32) + b1
    h = h * jax.nn.sigmoid(h)
    y = jnp.dot(h.astype(compute_dtype), w2.astype(compute_dtype),
                preferred_element_type=jnp.float32) + b2
    return y.astype(x.dtype)


def _make_params(key, encoder_dim, expansion):
    hidden = encoder_dim * expansion
    kg, kb, kw1, kb1, kw2, kb2 = jax.random.split(key, 6)
    gamma = jnp.ones((encoder_dim,), jnp.float32) + 0.01 * jax.random.normal(
        kg, (encoder_dim,), dtype=jnp.float32)
    beta = 0.01 * jax.random.normal(kb, (encoder_dim,), dtype=jnp.float32)
    w1 = jax.random.normal(kw1, (encoder_dim, hidden), jnp.float32) / jnp.sqrt(
        float(encoder_dim))
    b1 = 0.01 * jax.random.normal(kb1, (hidden,), dtype=jnp.float32)
    w2 = jax.random.normal(kw2, (hidden, encoder_dim), jnp.float32) / jnp.sqrt(
        float(hidden))
    b2 = 0.01 * jax.random.normal(kb2, (encoder_dim,), dtype=jnp.float32)
    return gamma, beta, w1, b1, w2, b2


if __name__ == "__main__":
    key = jax.random.PRNGKey(0)
    k1, k2, k3, kx1, kx2, kx3 = jax.random.split(key, 6)

    # Case 1: lane-aligned encoder_dim, default bf16-weight MXU path.
    batch, seq, encoder_dim, expansion = 2, 16, 128, 4
    params1 = _make_params(k1, encoder_dim, expansion)
    x1 = jax.random.normal(kx1, (batch, seq, encoder_dim), dtype=jnp.float32)
    out1 = jax.block_until_ready(feed_forward_module(x1, *params1))
    ref1 = _reference(x1, *params1, compute_dtype=jnp.bfloat16)
    assert out1.shape == x1.shape
    assert jnp.allclose(out1, ref1, atol=2e-2, rtol=2e-2)

    # Case 2: non-128-aligned feature dim (masked LayerNorm path), exact f32 compute.
    batch2, seq2, encoder_dim2 = 2, 8, 32
    params2 = _make_params(k2, encoder_dim2, expansion)
    x2 = jax.random.normal(kx2, (batch2, seq2, encoder_dim2), dtype=jnp.float32)
    out2 = jax.block_until_ready(
        feed_forward_module(x2, *params2, compute_dtype=jnp.float32))
    ref2 = _reference(x2, *params2, compute_dtype=jnp.float32)
    assert out2.shape == x2.shape
    assert jnp.allclose(out2, ref2, atol=1e-4, rtol=1e-4)

    # Case 3: row count not divisible by the row tile (partial tail tile) and
    # hidden-dim chunking with grid_k > 1, exact f32 compute.
    batch3, seq3, encoder_dim3 = 3, 17, 128
    params3 = _make_params(k3, encoder_dim3, expansion)
    x3 = jax.random.normal(kx3, (batch3, seq3, encoder_dim3), dtype=jnp.float32)
    out3 = jax.block_until_ready(
        feed_forward_module(x3, *params3, compute_dtype=jnp.float32,
                            tile_hidden=128))
    ref3 = _reference(x3, *params3, compute_dtype=jnp.float32)
    assert out3.shape == x3.shape
    assert jnp.allclose(out3, ref3, atol=1e-4, rtol=1e-4)

    print("KERNEL_OK")
</pallas_src>

<mosaic_0001>
module attributes {stable_mosaic.version = 11 : i64} {
  func.func @_ffn_kernel(%arg0: i32, %arg1: i32, %arg2: memref<16x128xf32, #tpu.memory_space<vmem>>, %arg3: memref<1x128xf32, #tpu.memory_space<vmem>>, %arg4: memref<1x128xf32, #tpu.memory_space<vmem>>, %arg5: memref<128x512xbf16, #tpu.memory_space<vmem>>, %arg6: memref<1x512xf32, #tpu.memory_space<vmem>>, %arg7: memref<512x128xbf16, #tpu.memory_space<vmem>>, %arg8: memref<1x128xf32, #tpu.memory_space<vmem>>, %arg9: memref<16x128xf32, #tpu.memory_space<vmem>>, %arg10: memref<16x128xbf16, #tpu.memory_space<vmem>>, %arg11: memref<16x128xf32, #tpu.memory_space<vmem>>) attributes {dimension_semantics = [#tpu.dimension_semantics<parallel>, #tpu.dimension_semantics<arbitrary>], iteration_bounds = array<i64: 2, 1>, scalar_prefetch = 0 : i64, scratch_operands = 2 : i64, tpu.core_type = #tpu.core_type<tc>, window_params = [{transform_indices = @transform_0, window_bounds = array<i64: 16, 128>}, {pipeline_mode = #tpu.pipeline_mode<synchronous>, transform_indices = @transform_1, window_bounds = array<i64: 1, 128>}, {pipeline_mode = #tpu.pipeline_mode<synchronous>, transform_indices = @transform_2, window_bounds = array<i64: 1, 128>}, {transform_indices = @transform_3, window_bounds = array<i64: 128, 512>}, {transform_indices = @transform_4, window_bounds = array<i64: 1, 512>}, {transform_indices = @transform_5, window_bounds = array<i64: 512, 128>}, {pipeline_mode = #tpu.pipeline_mode<synchronous>, transform_indices = @transform_6, window_bounds = array<i64: 1, 128>}, {transform_indices = @transform_7, window_bounds = array<i64: 16, 128>}]} {
    %c0_i32 = arith.constant 0 : i32
    %0 = arith.cmpi eq, %arg1, %c0_i32 : i32
    %1 = arith.extui %0 : i1 to i32
    %c0_i32_0 = arith.constant 0 : i32
    %2 = arith.cmpi ne, %1, %c0_i32_0 : i32
    scf.if %2 {
      %c0_16 = arith.constant 0 : index
      %c0_17 = arith.constant 0 : index
      %24 = vector.load %arg2[%c0_16, %c0_17] : memref<16x128xf32, #tpu.memory_space<vmem>>, vector<16x128xf32>
      %cst_18 = arith.constant dense<0.000000e+00> : vector<16xf32>
      %25 = vector.multi_reduction <add>, %24, %cst_18 [1] : vector<16x128xf32> to vector<16xf32>
      %26 = vector.shape_cast %25 : vector<16xf32> to vector<16x1xf32>
      %cst_19 = arith.constant 7.812500e-03 : f32
      %27 = vector.broadcast %cst_19 : f32 to vector<16x1xf32>
      %28 = arith.mulf %26, %27 : vector<16x1xf32>
      %29 = vector.broadcast %28 : vector<16x1xf32> to vector<16x128xf32>
      %30 = arith.subf %24, %29 : vector<16x128xf32>
      %31 = arith.mulf %30, %30 : vector<16x128xf32>
      %cst_20 = arith.constant dense<0.000000e+00> : vector<16xf32>
      %32 = vector.multi_reduction <add>, %31, %cst_20 [1] : vector<16x128xf32> to vector<16xf32>
      %33 = vector.shape_cast %32 : vector<16xf32> to vector<16x1xf32>
      %cst_21 = arith.constant 7.812500e-03 : f32
      %34 = vector.broadcast %cst_21 : f32 to vector<16x1xf32>
      %35 = arith.mulf %33, %34 : vector<16x1xf32>
      %cst_22 = arith.constant 9.99999974E-6 : f32
      %36 = vector.broadcast %cst_22 : f32 to vector<16x1xf32>
      %37 = arith.addf %35, %36 : vector<16x1xf32>
      %38 = math.rsqrt %37 : vector<16x1xf32>
      %39 = vector.broadcast %38 : vector<16x1xf32> to vector<16x128xf32>
      %40 = arith.mulf %30, %39 : vector<16x128xf32>
      %c0_23 = arith.constant 0 : index
      %c0_24 = arith.constant 0 : index
      %41 = vector.load %arg3[%c0_23, %c0_24] : memref<1x128xf32, #tpu.memory_space<vmem>>, vector<1x128xf32>
      %42 = vector.broadcast %41 : vector<1x128xf32> to vector<16x128xf32>
      %43 = arith.mulf %40, %42 : vector<16x128xf32>
      %c0_25 = arith.constant 0 : index
      %c0_26 = arith.constant 0 : index
      %44 = vector.load %arg4[%c0_25, %c0_26] : memref<1x128xf32, #tpu.memory_space<vmem>>, vector<1x128xf32>
      %45 = vector.broadcast %44 : vector<1x128xf32> to vector<16x128xf32>
      %46 = arith.addf %43, %45 : vector<16x128xf32>
      %47 = arith.truncf %46 : vector<16x128xf32> to vector<16x128xbf16>
      %c0_27 = arith.constant 0 : index
      %c0_28 = arith.constant 0 : index
      %48 = vector.load %arg10[%c0_27, %c0_28] : memref<16x128xbf16, #tpu.memory_space<vmem>>, vector<16x128xbf16>
      tpu.vector_store %arg10[%c0_27, %c0_28], %47 {strides = array<i32>} : memref<16x128xbf16, #tpu.memory_space<vmem>>, vector<16x128xbf16>,
      %cst_29 = arith.constant 0.000000e+00 : f32
      %49 = vector.broadcast %cst_29 : f32 to vector<16x128xf32>
      %c0_30 = arith.constant 0 : index
      %c0_31 = arith.constant 0 : index
      %50 = vector.load %arg11[%c0_30, %c0_31] : memref<16x128xf32, #tpu.memory_space<vmem>>, vector<16x128xf32>
      tpu.vector_store %arg11[%c0_30, %c0_31], %49 {strides = array<i32>} : memref<16x128xf32, #tpu.memory_space<vmem>>, vector<16x128xf32>,
    } else {
    }
    %c0 = arith.constant 0 : index
    %c0_1 = arith.constant 0 : index
    %3 = vector.load %arg10[%c0, %c0_1] : memref<16x128xbf16, #tpu.memory_space<vmem>>, vector<16x128xbf16>
    %c0_2 = arith.constant 0 : index
    %c0_3 = arith.constant 0 : index
    %4 = vector.load %arg5[%c0_2, %c0_3] : memref<128x512xbf16, #tpu.memory_space<vmem>>, vector<128x512xbf16>
    %cst = arith.constant dense<0.000000e+00> : vector<16x512xf32>
    %5 = tpu.matmul %3, %4, %cst {dimension_numbers = #tpu.dot_dimension_numbers<[1], [0], [0], [1], [0, 0, 1, 1], [], []>} : vector<16x128xbf16>, vector<128x512xbf16>, vector<16x512xf32> -> vector<16x512xf32>
    %c0_4 = arith.constant 0 : index
    %c0_5 = arith.constant 0 : index
    %6 = vector.load %arg6[%c0_4, %c0_5] : memref<1x512xf32, #tpu.memory_space<vmem>>, vector<1x512xf32>
    %7 = vector.broadcast %6 : vector<1x512xf32> to vector<16x512xf32>
    %8 = arith.addf %5, %7 : vector<16x512xf32>
    %9 = arith.negf %8 : vector<16x512xf32>
    %10 = math.exp %9 : vector<16x512xf32>
    %cst_6 = arith.constant 1.000000e+00 : f32
    %11 = vector.broadcast %cst_6 : f32 to vector<16x512xf32>
    %12 = arith.addf %11, %10 : vector<16x512xf32>
    %13 = arith.divf %11, %12 : vector<16x512xf32>
    %14 = arith.mulf %8, %13 : vector<16x512xf32>
    %c0_7 = arith.constant 0 : index
    %c0_8 = arith.constant 0 : index
    %15 = vector.load %arg11[%c0_7, %c0_8] : memref<16x128xf32, #tpu.memory_space<vmem>>, vector<16x128xf32>
    %16 = arith.truncf %14 : vector<16x512xf32> to vector<16x512xbf16>
    %c0_9 = arith.constant 0 : index
    %c0_10 = arith.constant 0 : index
    %17 = vector.load %arg7[%c0_9, %c0_10] : memref<512x128xbf16, #tpu.memory_space<vmem>>, vector<512x128xbf16>
    %cst_11 = arith.constant dense<0.000000e+00> : vector<16x128xf32>
    %18 = tpu.matmul %16, %17, %cst_11 {dimension_numbers = #tpu.dot_dimension_numbers<[1], [0], [0], [1], [0, 0, 1, 1], [], []>} : vector<16x512xbf16>, vector<512x128xbf16>, vector<16x128xf32> -> vector<16x128xf32>
    %19 = arith.addf %15, %18 : vector<16x128xf32>
    %c0_12 = arith.constant 0 : index
    %c0_13 = arith.constant 0 : index
    %20 = vector.load %arg11[%c0_12, %c0_13] : memref<16x128xf32, #tpu.memory_space<vmem>>, vector<16x128xf32>
    tpu.vector_store %arg11[%c0_12, %c0_13], %19 {strides = array<i32>} : memref<16x128xf32, #tpu.memory_space<vmem>>, vector<16x128xf32>,
    %c0_i32_14 = arith.constant 0 : i32
    %21 = arith.cmpi eq, %arg1, %c0_i32_14 : i32
    %22 = arith.extui %21 : i1 to i32
    %c0_i32_15 = arith.constant 0 : i32
    %23 = arith.cmpi ne, %22, %c0_i32_15 : i32
    scf.if %23 {
      %c0_16 = arith.constant 0 : index
      %c0_17 = arith.constant 0 : index
      %24 = vector.load %arg11[%c0_16, %c0_17] : memref<16x128xf32, #tpu.memory_space<vmem>>, vector<16x128xf32>
      %c0_18 = arith.constant 0 : index
      %c0_19 = arith.constant 0 : index
      %25 = vector.load %arg8[%c0_18, %c0_19] : memref<1x128xf32, #tpu.memory_space<vmem>>, vector<1x128xf32>
      %26 = vector.broadcast %25 : vector<1x128xf32> to vector<16x128xf32>
      %27 = arith.addf %24, %26 : vector<16x128xf32>
      %c0_20 = arith.constant 0 : index
      %c0_21 = arith.constant 0 : index
      %28 = vector.load %arg9[%c0_20, %c0_21] : memref<16x128xf32, #tpu.memory_space<vmem>>, vector<16x128xf32>
      tpu.vector_store %arg9[%c0_20, %c0_21], %27 {strides = array<i32>} : memref<16x128xf32, #tpu.memory_space<vmem>>, vector<16x128xf32>,
    } else {
    }
    return
  }
  func.func @transform_0(%arg0: i32, %arg1: i32) -> (i32, i32) {
    %c0_i32 = arith.constant 0 : i32
    %c0_i32_0 = arith.constant 0 : i32
    return %arg0, %c0_i32 : i32, i32
  }
  func.func @transform_1(%arg0: i32, %arg1: i32) -> (i32, i32) {
    %c0_i32 = arith.constant 0 : i32
    %c0_i32_0 = arith.constant 0 : i32
    %c0_i32_1 = arith.constant 0 : i32
    return %c0_i32, %c0_i32_0 : i32, i32
  }
  func.func @transform_2(%arg0: i32, %arg1: i32) -> (i32, i32) {
    %c0_i32 = arith.constant 0 : i32
    %c0_i32_0 = arith.constant 0 : i32
    %c0_i32_1 = arith.constant 0 : i32
    return %c0_i32, %c0_i32_0 : i32, i32
  }
  func.func @transform_3(%arg0: i32, %arg1: i32) -> (i32, i32) {
    %c0_i32 = arith.constant 0 : i32
    %c0_i32_0 = arith.constant 0 : i32
    return %c0_i32, %arg1 : i32, i32
  }
  func.func @transform_4(%arg0: i32, %arg1: i32) -> (i32, i32) {
    %c0_i32 = arith.constant 0 : i32
    %c0_i32_0 = arith.constant 0 : i32
    return %c0_i32, %arg1 : i32, i32
  }
  func.func @transform_5(%arg0: i32, %arg1: i32) -> (i32, i32) {
    %c0_i32 = arith.constant 0 : i32
    %c0_i32_0 = arith.constant 0 : i32
    return %arg1, %c0_i32 : i32, i32
  }
  func.func @transform_6(%arg0: i32, %arg1: i32) -> (i32, i32) {
    %c0_i32 = arith.constant 0 : i32
    %c0_i32_0 = arith.constant 0 : i32
    %c0_i32_1 = arith.constant 0 : i32
    return %c0_i32, %c0_i32_0 : i32, i32
  }
  func.func @transform_7(%arg0: i32, %arg1: i32) -> (i32, i32) {
    %c0_i32 = arith.constant 0 : i32
    %c0_i32_0 = arith.constant 0 : i32
    return %arg0, %c0_i32 : i32, i32
  }
}

</mosaic_0001>

<bundles_post_ra>
// kernel: tpu_custom_call.1
= control target key start
LH: loop header
LB: loop body
LE: loop exit
PB: predicated region body
PF: predicated region fallthrough
CT: control target
= control target key end

     0   :  { %s2095_s0 = inlined_call_operand.hbm [shape: f32[32,128], index: 0, kind: input, shape index: {}]   ;;  %s2096_s1 = inlined_call_operand.vmem [shape: f32[1,128], index: 1, kind: input, shape index: {}]   ;;  %s2097_s2 = inlined_call_operand.vmem [shape: f32[1,128], index: 2, kind: input, shape index: {}]   ;;  %s2098_s3 = inlined_call_operand.hbm [shape: bf16[128,512], index: 3, kind: input, shape index: {}]   ;;  %s2099_s4 = inlined_call_operand.vmem [shape: f32[1,512], index: 4, kind: input, shape index: {}]   ;;  %s2100_s5 = inlined_call_operand.hbm [shape: bf16[512,128], index: 5, kind: input, shape index: {}]   ;;  %s2101_s6 = inlined_call_operand.vmem [shape: f32[1,128], index: 6, kind: input, shape index: {}]   ;;  %s2102_s7 = inlined_call_operand.hbm [shape: f32[32,128], index: 7, kind: output, shape index: {}]  }
   0x1   :  { %2107 = sst [smem:[#allocation15_spill]] %s2098_s3 }
   0x2   :  { %2108 = sst [smem:[#allocation16_spill]] %s2100_s5 }
   0x3   :  { %12 = vsyncpa [#allocation5], 0 }
   0x4   :  { %14 = vsyncpa [#allocation5 + $0x1], 0 }
   0x5   :  { %15 = vsyncpa [#allocation8], 0 }
   0x6   :  { %16 = vsyncpa [#allocation6], 0 }
   0x7   :  { %18 = vsyncpa [#allocation6 + $0x1], 0  ;;  %s1873_s24 = smov 0   ;;  %s1875_s25 = smov 0  }
   0x8   :  { %s1877_s26 = smov 0   ;;  %s1879_s27 = smov 0  }
   0x9   :  { %s1881_s28 = smov 0   ;;  %s1883_s29 = smov 0  }
   0xa LB: > { %s1294_s30 = sadd.s32 4294967295, %s1818_s29   ;;  %s1295_s8 = sadd.s32 4294967294, %s1818_s29   ;;  %s1818_s29 = sphi %s1883_s29, %s24_s29   ;;  %s1814_s28 = sphi %s1881_s28, %s2129_s28   ;;  %s1810_s27 = sphi %s1879_s27, %s2128_s27   ;;  %s1806_s26 = sphi %s1877_s26, %s2127_s26   ;;  %s1802_s25 = sphi %s1875_s25, %s2126_s25   ;;  %s1798_s24 = sphi %s1873_s24, %s2125_s24  }
   0xb   : > { %p56_p0 = scmp.ne.s32.totalorder %s1802_s25, %s1798_s24  ;;  %p1907_p1 = scmp.eq.s32.totalorder %s1294_s30, 0 }
   0xc   : > { %p1911_p2 = scmp.eq.s32.totalorder %s1294_s30, 1  ;;  %p227_p3 = scmp.eq.s32.totalorder %s1295_s8, 1 }
   0xd   : > { %s2109_s9 = scalar_select %p1907_p1, 1, 0 }
   0xe   : > { %p1917_p4 = por %p1907_p1, %p56_p0  ;;  %p1296_p5 = scmp.ge.s32.totalorder %s1818_s29, 1 }
   0xf   : > { %p1922_p6 = por %p227_p3, %p56_p0  ;;  %p234_p7 = scmp.lt.s32.totalorder %s1818_s29, 3 }
  0x10   : > { %s2111_s11 = scalar_select %p1917_p4, 1, 0 }
  0x11   : > { %s2112_s12 = scalar_select %p1922_p6, 1, 0 }
  0x12   : > { %p1927_p8 = pnand %p1296_p5, %p234_p7  ;;  %s1820_s14 = smov [#allocation7]  }
  0x13   : > { %s255_s15 = sshll.u32 %s1820_s14, 4  ;;  %s1821_s17 = smov [#allocation9]   ;;  %s256_s15 = int_to_ptr.vmem [resolvable:$true] %s255_s15 }
  0x14   : > { %p1457_p9 = pneg %p1927_p8  ;;  %s279_s18 = sshll.u32 %s1821_s17, 4  ;;  %s280_s18 = int_to_ptr.vmem [resolvable:$true] %s279_s18 }
  0x15   : > { %s1665_s19 = scalar_lea.vmem %s256_s15, 4096  ;;  %p1673_p5 = scmp.lt.s32.totalorder %s256_s15, %s256_s15 }
  0x16   : > { %p1936_p11 = pnand %p1457_p9, %p1907_p1  ;;  %p1666_p13 = scmp.ne.s32.totalorder %s256_s15, %s1665_s19 }
  0x17   : > { %p1674_p7 = scmp.lt.s32.totalorder %s1665_s19, %s1665_s19 }
  0x18   : > { %p1656_p12 = pneg %p1936_p11 }
  0x19   : > { %p1675_p10 = por %p1674_p7, %p1673_p5 }
  0x1a   : > { %p1668_p0 = pnand %p1666_p13, %p1656_p12 }
  0x1c   : > { %p1669_p3 = pneg %p1668_p0 }
  0x1e   : > { %p1676_p9 = pnand %p1675_p10, %p1669_p3 }
  0x20   : > { %1679 = shalt.err (!%p1676_p9)
}
  0x21   : > { %s1822_s20 = smov 256   ;;  %s1823_s21 = smov 16  }
  0x22   : > { %s2115_s3 = sld [smem:[#allocation15_spill]]  ;;  %s1691_s30 = scalar_lea.vmem %s280_s18, 4096 }
  0x23   : > { %p1692_p6 = scmp.ne.s32.totalorder %s280_s18, %s1691_s30  ;;  %p1699_p1 = scmp.lt.s32.totalorder %s280_s18, %s280_s18 }
  0x24   : > { %p1700_p4 = scmp.lt.s32.totalorder %s1691_s30, %s1691_s30 }
  0x25   : > { %p1694_p13 = pnand %p1692_p6, %p1656_p12 }
  0x26   : > { %p1701_p5 = por %p1700_p4, %p1699_p1 }
  0x27   : > { %p1695_p0 = pneg %p1694_p13 }
  0x28   : > { %1460 = dma.hbm_to_vmem [thread:$0]  (!%p1936_p11), %s2115_s3, 4096, %s256_s15, [#allocation8], %s1822_s20, %s1822_s20, %s1823_s21  }
  0x29   : > { %p1702_p10 = pnand %p1701_p5, %p1695_p0 }
  0x2b   : > { %1705 = shalt.err (!%p1702_p10)
}
  0x2c   : > { %s1824_s8 = smov 64   ;;  %s1825_s14 = smov 4  }
  0x2d   : > { %s2116_s5 = sld [smem:[#allocation16_spill]]  ;;  %s36_s19 = sadd.s32 1, %s1814_s28 }
  0x2e   : > { %s43_s20 = sadd.s32 1, %s1806_s26  ;;  %p38_p1 = scmp.ge.s32.totalorder %s36_s19, 2 }
  0x2f   : > { %p50_p4 = scmp.ne.s32.totalorder %s1806_s26, %s1802_s25  ;;  %p51_p6 = scmp.eq.s32.totalorder %s1818_s29, 0 }
  0x30   : > { %p1474_p12 = scmp.lt.s32.totalorder %s1818_s29, 2  ;;  %s2131_s19 = smov (%p38_p1, %s36_s19), 0 }
  0x31   : > { %2117 = sst [smem:[#allocation14_spill]] %s2131_s19  ;;  %p52_p3 = por %p51_p6, %p50_p4 }
  0x32   : > { %p1968_p7 = por %p1911_p2, %p50_p4  ;;  %s40_s16 = ssub.s32 %s1814_s28, %s2131_s19 }
  0x33   : > { %1463 = dma.hbm_to_vmem [thread:$0]  (!%p1936_p11), %s2116_s5, 4096, %s280_s18, [#allocation8], %s1824_s8, %s1824_s8, %s1825_s14  }
  0x34   : > { %s296_s22 = sand.u32 1, %s1806_s26   ;;  %p41_p9 = scmp.eq.s32.totalorder %s40_s16, 0 }
  0x35   : > { %s1301_s18 = sshll.u32 %s296_s22, 4  ;;  %s1392_s23 = sshll.u32 %s1814_s28, 8 }
  0x36   : > { %s1977_s30 = scalar_select %p41_p9, %s1806_s26, %s43_s20  }
  0x37   : > { %s306_s15 = scalar_lea.hbm %s2095_s0, %s1392_s23  ;;  %s300_s17 = scalar_lea.vmem [#allocation4], %s1301_s18 }
  0x38   : > { %s307_s3 = sshll.u32 %s300_s17, 4  ;;  %p1984_p11 = pnand %p1474_p12, %p52_p3  ;;  %s308_s3 = int_to_ptr.vmem [resolvable:$true] %s307_s3 }
  0x39   : > { %s297_s5 = scalar_lea.sflag [#allocation5], %s296_s22  ;;  %s1719_s16 = scalar_lea.vmem %s308_s3, 256 }
  0x3a   : > { %p1708_p2 = pneg %p1984_p11  ;;  %p1720_p13 = scmp.ne.s32.totalorder %s308_s3, %s1719_s16 }
  0x3b   : > { %s1826_s20 = smov [#allocation4]  }
  0x3c   : > { %p1722_p0 = pnand %p1720_p13, %p1708_p2  ;;  %s1724_s19 = sshll.u32 %s1826_s20, 4  ;;  %s1725_s19 = int_to_ptr.vmem [resolvable:$false] %s1724_s19 }
  0x3d   : > { %s1726_s23 = scalar_lea.vmem %s1725_s19, 512  ;;  %p1727_p10 = scmp.lt.s32.totalorder %s308_s3, %s1725_s19 }
  0x3e   : > { %p1723_p5 = pneg %p1722_p0  ;;  %p1728_p1 = scmp.lt.s32.totalorder %s1726_s23, %s1719_s16 }
  0x40   : > { %p1729_p4 = por %p1728_p1, %p1727_p10 }
  0x42   : > { %p1730_p6 = pnand %p1729_p4, %p1723_p5 }
  0x44   : > { %1733 = shalt.err (!%p1730_p6)
}
  0x45   : > { %s1827_s18 = smov 128   ;;  %s1828_s8 = smov 8  }
  0x46   : > { %1467 = dma.hbm_to_vmem [thread:$0]  (!%p1984_p11), %s306_s15, 256, %s308_s3, %s297_s5, %s1827_s18, %s1827_s18, %s1828_s8  }
  0x47   : > { %319 = sbr.rel (%p1927_p8) target bundleno = 859 (0x35b), region = 48  ;;  %s1995_s22 = sand.u32 (!%p1927_p8), 1, %s1802_s25  }
  0x48   : > { %s1305_s19 = sshll.u32 (!%p1927_p8), %s1995_s22, 4  ;;  %s322_s14 = scalar_lea.sflag (!%p1927_p8), [#allocation5], %s1995_s22 }
  0x49   : > { %s325_s17 = scalar_lea.vmem (!%p1927_p8), [#allocation4], %s1305_s19  ;;  %p2120_p12 = scmp.ne.s32.totalorder (!%p1927_p8), %s2111_s11, 0 }
  0x4c   : > { %1785 = dma.done.wait (%p2120_p12), %s322_s14, 256  }
  0x4d   : > { %1787 = vsyncadd (%p2120_p12), %s322_s14, 4294967040  ;;  %p2121_p3 = scmp.ne.s32.totalorder %s2109_s9, 0 }
  0x4f   : > { %1789 = dma.done.wait (%p2121_p3), [#allocation8], 8192  }
  0x50   : > { %1791 = vsyncadd (%p2121_p3), [#allocation8], 4294959104  ;;  %v382_v0 = vld [vmem:[%s325_s17] sm:$0xff]  ;;  %v383_v1 = vld [vmem:[%s325_s17 + $0x8] sm:$0xff]  ;;  %v1829_v42 = vmov 0   ;;  %s367_s20 = scalar_lea.vmem [#allocation10], %s1305_s19 }
  0x51   : > { %384 = vadd.xlane.f32.xlu0 %v382_v0  ;;  %v1537_v10 = vld [vmem:[#allocation7 + $0xe4] ss:$16 sps:$4 sm:$0xff]   ;;  %v1539_v11 = vld [vmem:[#allocation7 + $0xec] ss:$16 sps:$4 sm:$0xff]   ;;  %v1541_v12 = vld [vmem:[#allocation7 + $0xe0] ss:$16 sps:$4 sm:$0xff]   ;;  %690 = vmatprep.mubr.bf16.mxu0 %v1829_v42 }
  0x52   : > { %v1542_v13 = vld [vmem:[#allocation7 + $0xe8] ss:$16 sps:$4 sm:$0xff]   ;;  %658 = vmatprep.subr.bf16.mxu0 %v1537_v10  ;;  %701 = vmatprep.subr.bf16.mxu1 %v1539_v11  ;;  %v1543_v14 = vld [vmem:[#allocation7 + $0xc4] ss:$16 sps:$4 sm:$0xff]   ;;  %v1545_v15 = vld [vmem:[#allocation7 + $0xcc] ss:$16 sps:$4 sm:$0xff]  }
  0x53   : > { %659 = vmatpush1.bf16.msra.mxu0 %v1541_v12  ;;  %702 = vmatpush1.bf16.msra.mxu1 %v1542_v13  ;;  %v1547_v16 = vld [vmem:[#allocation7 + $0xc0] ss:$16 sps:$4 sm:$0xff]   ;;  %v1548_v17 = vld [vmem:[#allocation7 + $0xc8] ss:$16 sps:$4 sm:$0xff]   ;;  %v1549_v18 = vld [vmem:[#allocation7 + $0xa4] ss:$16 sps:$4 sm:$0xff]  }
  0x54   : > { %660 = vmatprep.subr.bf16.mxu0 %v1543_v14  ;;  %703 = vmatprep.subr.bf16.mxu1 %v1545_v15  ;;  %v1551_v19 = vld [vmem:[#allocation7 + $0xac] ss:$16 sps:$4 sm:$0xff]   ;;  %v1553_v20 = vld [vmem:[#allocation7 + $0xa0] ss:$16 sps:$4 sm:$0xff]   ;;  %v1554_v21 = vld [vmem:[#allocation7 + $0xa8] ss:$16 sps:$4 sm:$0xff]  }
  0x55   : > { %386 = vadd.xlane.f32.xlu0 %v383_v1  ;;  %v1555_v22 = vld [vmem:[#allocation7 + $0x84] ss:$16 sps:$4 sm:$0xff]   ;;  %v1557_v23 = vld [vmem:[#allocation7 + $0x8c] ss:$16 sps:$4 sm:$0xff]   ;;  %v1559_v24 = vld [vmem:[#allocation7 + $0x80] ss:$16 sps:$4 sm:$0xff]   ;;  %733 = vmatprep.mubr.bf16.mxu1 %v1829_v42 }
  0x56   : > { %v1560_v25 = vld [vmem:[#allocation7 + $0x88] ss:$16 sps:$4 sm:$0xff]   ;;  %v1561_v26 = vld [vmem:[#allocation7 + $0x64] ss:$16 sps:$4 sm:$0xff]   ;;  %v1563_v27 = vld [vmem:[#allocation7 + $0x6c] ss:$16 sps:$4 sm:$0xff]  }
  0x57   : > { %661 = vmatpush1.bf16.msra.mxu0 %v1547_v16  ;;  %704 = vmatpush1.bf16.msra.mxu1 %v1548_v17  ;;  %v1565_v28 = vld [vmem:[#allocation7 + $0x60] ss:$16 sps:$4 sm:$0xff]   ;;  %v1566_v29 = vld [vmem:[#allocation7 + $0x68] ss:$16 sps:$4 sm:$0xff]   ;;  %v1567_v30 = vld [vmem:[#allocation7 + $0x44] ss:$16 sps:$4 sm:$0xff]  }
  0x58   : > { %662 = vmatprep.subr.bf16.mxu0 %v1549_v18  ;;  %705 = vmatprep.subr.bf16.mxu1 %v1551_v19  ;;  %v1569_v31 = vld [vmem:[#allocation7 + $0x4c] ss:$16 sps:$4 sm:$0xff]   ;;  %v1571_v32 = vld [vmem:[#allocation7 + $0x40] ss:$16 sps:$4 sm:$0xff]   ;;  %v1572_v33 = vld [vmem:[#allocation7 + $0x48] ss:$16 sps:$4 sm:$0xff]  }
  0x59   : > { %v1573_v34 = vld [vmem:[#allocation7 + $0x24] ss:$16 sps:$4 sm:$0xff]   ;;  %v1575_v35 = vld [vmem:[#allocation7 + $0x2c] ss:$16 sps:$4 sm:$0xff]   ;;  %v1577_v36 = vld [vmem:[#allocation7 + $0x20] ss:$16 sps:$4 sm:$0xff]  }
  0x5a   : > { %v1578_v37 = vld [vmem:[#allocation7 + $0x28] ss:$16 sps:$4 sm:$0xff]   ;;  %v1579_v38 = vld [vmem:[#allocation7 + $0x4] ss:$16 sps:$4 sm:$0xff]   ;;  %v1581_v39 = vld [vmem:[#allocation7 + $0xc] ss:$16 sps:$4 sm:$0xff]  }
  0x5b   : > { %663 = vmatpush1.bf16.msra.mxu0 %v1553_v20  ;;  %706 = vmatpush1.bf16.msra.mxu1 %v1554_v21  ;;  %v1583_v40 = vld [vmem:[#allocation7] ss:$16 sps:$4 sm:$0xff]   ;;  %v1584_v41 = vld [vmem:[#allocation7 + $0x8] ss:$16 sps:$4 sm:$0xff]   ;;  %s1178_s23 = sshll.u32 %s367_s20, 4  ;;  %s1395_s18 = sshll.u32 %s1810_s27, 8  ;;  %s2042_s23 = int_to_ptr.vmem [resolvable:$true] %s1178_s23 }
  0x5c   : > { %664 = vmatprep.subr.bf16.mxu0 %v1555_v22  ;;  %707 = vmatprep.subr.bf16.mxu1 %v1557_v23  ;;  %v1309_v51 = vld [vmem:[%s2096_s1] ss:$0 sm:$0xff]  ;;  %v1599_v10 = vld [vmem:[#allocation9 + $0xe0] sm:$0xff]   ;;  %v1606_v17 = vld [vmem:[#allocation9 + $0x50] sm:$0xff]   ;;  %s2047_s17 = scalar_lea.hbm %s2102_s7, %s1395_s18  ;;  %s1165_s19 = scalar_lea.sflag [#allocation6], %s1995_s22 }
  0x5d   : > { %v1310_v55 = vld [vmem:[%s2097_s2] ss:$0 sm:$0xff]  ;;  %v1600_v11 = vld [vmem:[#allocation9 + $0x20] sm:$0xff]   ;;  %v1607_v18 = vld [vmem:[#allocation9 + $0xd0] sm:$0xff]   ;;  %s1734_s3 = scalar_lea.vmem %s2042_s23, 256  ;;  %s1830_s27 = smov [#allocation10]  }
  0x5e   : > { %v1586_v61 = vld [vmem:[#allocation9 + $0x78] sm:$0xff]   ;;  %v1601_v12 = vld [vmem:[#allocation9 + $0xa0] sm:$0xff]   ;;  %v1608_v19 = vld [vmem:[#allocation9 + $0x10] sm:$0xff]   ;;  %p1735_p8 = scmp.ne.s32.totalorder %s2042_s23, %s1734_s3  ;;  %s1738_s5 = sshll.u32 %s1830_s27, 4  ;;  %s1739_s5 = int_to_ptr.vmem [resolvable:$false] %s1738_s5 }
  0x5f   : > { %665 = vmatpush1.bf16.msra.mxu0 %v1559_v24  ;;  %708 = vmatpush1.bf16.msra.mxu1 %v1560_v25  ;;  %v1587_v62 = vld [vmem:[#allocation9 + $0xf8] sm:$0xff]   ;;  %v1609_v20 = vld [vmem:[#allocation9 + $0x90] sm:$0xff]   ;;  %v1610_v21 = vld [vmem:[#allocation9 + $0x48] sm:$0xff]   ;;  %s1740_s9 = scalar_lea.vmem %s1739_s5, 512  ;;  %p1741_p2 = scmp.lt.s32.totalorder %s2042_s23, %s1739_s5 }
  0x60   : > { %666 = vmatprep.subr.bf16.mxu0 %v1561_v26  ;;  %709 = vmatprep.subr.bf16.mxu1 %v1563_v27  ;;  %v1588_v63 = vld [vmem:[#allocation9 + $0x38] sm:$0xff]   ;;  %v1611_v22 = vld [vmem:[#allocation9 + $0xc8] sm:$0xff]   ;;  %v1614_v25 = vld [vmem:[#allocation9 + $0x40] sm:$0xff]   ;;  %p1736_p9 = pnand %p1735_p8, %p1968_p7  ;;  %p1742_p13 = scmp.lt.s32.totalorder %s1740_s9, %s1734_s3 }
  0x61   : > { %v1602_v13 = vld [vmem:[#allocation9 + $0x58] sm:$0xff]   ;;  %v1612_v23 = vld [vmem:[#allocation9 + $0x8] sm:$0xff]   ;;  %v1615_v26 = vld [vmem:[#allocation9 + $0xc0] sm:$0xff]  }
  0x62   : > { %v1603_v14 = vld [vmem:[#allocation9 + $0xd8] sm:$0xff]   ;;  %v1613_v24 = vld [vmem:[#allocation9 + $0x88] sm:$0xff]   ;;  %v1616_v27 = vld [vmem:[#allocation9] sm:$0xff]   ;;  %p1737_p11 = pneg %p1736_p9  ;;  %p1743_p0 = por %p1742_p13, %p1741_p2 }
  0x63   : > { %667 = vmatpush1.bf16.msra.mxu0 %v1565_v28  ;;  %710 = vmatpush1.bf16.msra.mxu1 %v1566_v29  ;;  %v1604_v15 = vld [vmem:[#allocation9 + $0x18] sm:$0xff]   ;;  %v1617_v28 = vld [vmem:[#allocation9 + $0x80] sm:$0xff]   ;;  %v472_v29 = vlaneseq }
  0x64   : > { %668 = vmatprep.subr.bf16.mxu0 %v1567_v30  ;;  %711 = vmatprep.subr.bf16.mxu1 %v1569_v31  ;;  %v1605_v16 = vld [vmem:[#allocation9 + $0x98] sm:$0xff]   ;;  %p1744_p5 = pnand %p1743_p0, %p1737_p11 }
  0x65   : > { %v473_v30 = vshrl.u32 %v472_v29, 7 }
  0x67   : > { %669 = vmatpush1.bf16.msra.mxu0 %v1571_v32  ;;  %712 = vmatpush1.bf16.msra.mxu1 %v1572_v33  ;;  %v474_v31 = vsub.s32 0, %v473_v30  ;;  %v482_v32 = vsub.s32 2, %v473_v30  ;;  %v470_v33 = vld [vmem:[%s2099_s4] sm:$0xf] }
  0x68   : > { %670 = vmatprep.subr.bf16.mxu0 %v1573_v34  ;;  %713 = vmatprep.subr.bf16.mxu1 %v1575_v35  ;;  %v478_v34 = vsub.s32 1, %v473_v30  ;;  %v486_v35 = vsub.s32 3, %v473_v30 }
  0x6b   : > { %671 = vmatpush1.bf16.msra.mxu0 %v1577_v36  ;;  %714 = vmatpush1.bf16.msra.mxu1 %v1578_v37  ;;  %v475_v36 = vrot.slane %v470_v33, %v474_v31  ;;  %v483_v37 = vrot.slane %v470_v33, %v482_v32 }
  0x6c   : > { %672 = vmatprep.subr.bf16.mxu0 %v1579_v38  ;;  %715 = vmatprep.subr.bf16.mxu1 %v1581_v39  ;;  %v479_v38 = vrot.slane %v470_v33, %v478_v34  ;;  %v487_v39 = vrot.slane %v470_v33, %v486_v35 }
  0x6f   : > { %673 = vmatpush1.bf16.msra.mxu0 %v1583_v40  ;;  %716 = vmatpush1.bf16.msra.mxu1 %v1584_v41 }
  0x70   : > { %1401 = vmatprep.subr.bf16.mxu0 %v1586_v61  ;;  %1423 = vmatprep.subr.bf16.mxu1 %v1587_v62 }
  0xda   : > { %v385_v2 = vpop.xlane.xlu0 %384 }
  0xdb   : > { %v388_v3 = vmul.f32 0.0078125, %v385_v2  ;;  %v1591_v2 = vld [vmem:[#allocation9 + $0xf0] sm:$0xff]  }
  0xdd   : > { %v2009_v4 = vsub.f32 %v382_v0, %v388_v3  ;;  %v1589_v0 = vld [vmem:[#allocation9 + $0xb8] sm:$0xff]   ;;  %v1592_v3 = vld [vmem:[#allocation9 + $0x30] sm:$0xff]  }
  0xde   : > { %v387_v5 = vpop.xlane.xlu0 %386 }
  0xdf   : > { %v389_v6 = vmul.f32 0.0078125, %v387_v5  ;;  %v392_v7 = vmul.f32 %v2009_v4, %v2009_v4  ;;  %v1594_v5 = vld [vmem:[#allocation9 + $0x68] sm:$0xff]  }
  0xe1   : > { %v2013_v8 = vsub.f32 %v383_v1, %v389_v6  ;;  %394 = vadd.xlane.f32.xlu1 %v392_v7  ;;  %v1590_v1 = vld [vmem:[#allocation9 + $0x70] sm:$0xff]   ;;  %v1595_v6 = vld [vmem:[#allocation9 + $0xe8] sm:$0xff]  }
  0xe2   : > { %v1596_v7 = vld [vmem:[#allocation9 + $0x28] sm:$0xff]  }
  0xe3   : > { %v393_v9 = vmul.f32 %v2013_v8, %v2013_v8 }
  0xe5   : > { %396 = vadd.xlane.f32.xlu1 %v393_v9  ;;  %v1598_v9 = vld [vmem:[#allocation9 + $0x60] sm:$0xff]  }
 0x16a   : > { %v395_v43 = vpop.xlane.xlu1 %394 }
 0x16b   : > { %v398_v44 = vmul.f32 0.0078125, %v395_v43 }
 0x16d   : > { %v400_v45 = vadd.f32 1e-05, %v398_v44 }
 0x16e   : > { %v397_v46 = vpop.xlane.xlu1 %396 }
 0x16f   : > { %1618 = vrsqrt.f32 %v400_v45  ;;  %v399_v47 = vmul.f32 0.0078125, %v397_v46 }
 0x171   : > { %v401_v48 = vadd.f32 1e-05, %v399_v47 }
 0x173   : > { %1620 = vrsqrt.f32 %v401_v48 }
 0x17c   : > { %v1619_v49 = vpop.eup %1618 }
 0x17d   : > { %v404_v50 = vmul.f32 %v1619_v49, %v2009_v4  ;;  %v1593_v4 = vld [vmem:[#allocation9 + $0xb0] sm:$0xff]  }
 0x17f   : > { %v413_v53 = vmul.f32 %v1309_v51, %v404_v50 }
 0x180   : > { %v1621_v52 = vpop.eup %1620 }
 0x181   : > { %v405_v54 = vmul.f32 %v1621_v52, %v2013_v8  ;;  %v422_v57 = vadd.f32 %v1310_v55, %v413_v53  ;;  %v1597_v8 = vld [vmem:[#allocation9 + $0xa8] sm:$0xff]  }
 0x183   : > { %v414_v56 = vmul.f32 %v1309_v51, %v405_v54 }
 0x185   : > { %v423_v58 = vadd.f32 %v1310_v55, %v414_v56 }
 0x187   : > { %v1399_v59 = vpack.c.bf16 %v423_v58, %v422_v57 }
 0x189   : > { %1400 = vst [vmem:[#allocation2] sm:$0xff] %v1399_v59  }
 0x190   : > { %v1585_v60 = vld [vmem:[#allocation2] sm:$0xff]  }
 0x191   : > { %691 = vmatmul.mubr.bf16.vlgmr.msra.gmra.mxu0 %v1585_v60  ;;  %734 = vmatmul.mubr.bf16.vlgmr.msra.gmra.mxu1 %v1585_v60 }
 0x192   : > { %1402 = vmatpush3.bf16.msra.mxu0 %v1588_v63  ;;  %1424 = vmatpush3.bf16.msra.mxu1 %v1589_v0 }
 0x193   : > { %1403 = vmatprep.subr.bf16.mxu0 %v1590_v1  ;;  %1425 = vmatprep.subr.bf16.mxu1 %v1591_v2 }
 0x196   : > { %1404 = vmatpush3.bf16.msra.mxu0 %v1592_v3  ;;  %1426 = vmatpush3.bf16.msra.mxu1 %v1593_v4 }
 0x197   : > { %1405 = vmatprep.subr.bf16.mxu0 %v1594_v5  ;;  %1427 = vmatprep.subr.bf16.mxu1 %v1595_v6 }
 0x19a   : > { %1406 = vmatpush3.bf16.msra.mxu0 %v1596_v7  ;;  %1428 = vmatpush3.bf16.msra.mxu1 %v1597_v8 }
 0x19b   : > { %1407 = vmatprep.subr.bf16.mxu0 %v1598_v9  ;;  %1429 = vmatprep.subr.bf16.mxu1 %v1599_v10 }
 0x19e   : > { %1408 = vmatpush3.bf16.msra.mxu0 %v1600_v11  ;;  %1430 = vmatpush3.bf16.msra.mxu1 %v1601_v12 }
 0x19f   : > { %1409 = vmatprep.subr.bf16.mxu0 %v1602_v13  ;;  %1431 = vmatprep.subr.bf16.mxu1 %v1603_v14 }
 0x1a2   : > { %1410 = vmatpush3.bf16.msra.mxu0 %v1604_v15  ;;  %1432 = vmatpush3.bf16.msra.mxu1 %v1605_v16 }
 0x1a3   : > { %1411 = vmatprep.subr.bf16.mxu0 %v1606_v17  ;;  %1433 = vmatprep.subr.bf16.mxu1 %v1607_v18 }
 0x1a6   : > { %1412 = vmatpush3.bf16.msra.mxu0 %v1608_v19  ;;  %1434 = vmatpush3.bf16.msra.mxu1 %v1609_v20 }
 0x1a7   : > { %1413 = vmatprep.subr.bf16.mxu0 %v1610_v21  ;;  %1435 = vmatprep.subr.bf16.mxu1 %v1611_v22 }
 0x1aa   : > { %1414 = vmatpush3.bf16.msra.mxu0 %v1612_v23  ;;  %1436 = vmatpush3.bf16.msra.mxu1 %v1613_v24 }
 0x1ab   : > { %1415 = vmatprep.subr.bf16.mxu0 %v1614_v25  ;;  %1437 = vmatprep.subr.bf16.mxu1 %v1615_v26 }
 0x1ae   : > { %1416 = vmatpush3.bf16.msra.mxu0 %v1616_v27  ;;  %1438 = vmatpush3.bf16.msra.mxu1 %v1617_v28 }
 0x251   : > { %v692_v40 = vpop.f32.mrf.mxu0  ;;  %v735_v41 = vpop.f32.mrf.mxu1 }
 0x252   : > { %v2028_v42 = vadd.f32 %v692_v40, %v475_v36  ;;  %v2030_v43 = vadd.f32 %v735_v41, %v483_v37 }
 0x253   : > { %v694_v44 = vpop.f32.mrf.mxu0  ;;  %v737_v45 = vpop.f32.mrf.mxu1 }
 0x254   : > { %v1346_v46 = vmul.f32 -1.442695, %v2028_v42  ;;  %v1348_v47 = vmul.f32 -1.442695, %v2030_v43  ;;  %v695_v48 = vadd.f32 %v694_v44, %v479_v38  ;;  %v738_v49 = vadd.f32 %v737_v45, %v487_v39 }
 0x255   : > { %v696_v50 = vpop.f32.mrf.mxu0  ;;  %v739_v51 = vpop.f32.mrf.mxu1 }
 0x256   : > { %1622 = vpow2.f32 %v1346_v46  ;;  %v1347_v52 = vmul.f32 -1.442695, %v695_v48  ;;  %v1349_v53 = vmul.f32 -1.442695, %v738_v49  ;;  %v697_v54 = vadd.f32 %v696_v50, %v475_v36 }
 0x257   : > { %1624 = vpow2.f32 %v1348_v47  ;;  %v740_v55 = vadd.f32 %v739_v51, %v483_v37  ;;  %v698_v56 = vpop.f32.mrf.mxu0  ;;  %v741_v57 = vpop.f32.mrf.mxu1 }
 0x258   : > { %1626 = vpow2.f32 %v1347_v52  ;;  %v1350_v58 = vmul.f32 -1.442695, %v697_v54  ;;  %v699_v59 = vadd.f32 %v698_v56, %v479_v38  ;;  %v742_v60 = vadd.f32 %v741_v57, %v487_v39 }
 0x259   : > { %1628 = vpow2.f32 %v1349_v53  ;;  %v1352_v61 = vmul.f32 -1.442695, %v740_v55 }
 0x25a   : > { %1630 = vpow2.f32 %v1350_v58  ;;  %v1351_v62 = vmul.f32 -1.442695, %v699_v59  ;;  %v1353_v63 = vmul.f32 -1.442695, %v742_v60 }
 0x25b   : > { %1632 = vpow2.f32 %v1352_v61 }
 0x25c   : > { %1634 = vpow2.f32 %v1351_v62 }
 0x25d   : > { %1636 = vpow2.f32 %v1353_v63 }
 0x263   : > { %v1623_v0 = vpop.eup %1622 }
 0x264   : > { %v1625_v1 = vpop.eup %1624  ;;  %v768_v2 = vadd.f32 1.0, %v1623_v0 }
 0x265   : > { %v1627_v3 = vpop.eup %1626  ;;  %v770_v4 = vadd.f32 1.0, %v1625_v1 }
 0x266   : > { %v1629_v5 = vpop.eup %1628  ;;  %1638 = vrcp.f32 %v768_v2  ;;  %v769_v6 = vadd.f32 1.0, %v1627_v3 }
 0x267   : > { %v1631_v7 = vpop.eup %1630  ;;  %1640 = vrcp.f32 %v770_v4  ;;  %v771_v8 = vadd.f32 1.0, %v1629_v5 }
 0x268   : > { %v1633_v9 = vpop.eup %1632  ;;  %1642 = vrcp.f32 %v769_v6  ;;  %v772_v10 = vadd.f32 1.0, %v1631_v7 }
 0x269   : > { %v1635_v11 = vpop.eup %1634  ;;  %1644 = vrcp.f32 %v771_v8  ;;  %v774_v12 = vadd.f32 1.0, %v1633_v9 }
 0x26a   : > { %v1637_v13 = vpop.eup %1636  ;;  %1646 = vrcp.f32 %v772_v10  ;;  %v773_v14 = vadd.f32 1.0, %v1635_v11 }
 0x26b   : > { %1648 = vrcp.f32 %v774_v12  ;;  %v775_v15 = vadd.f32 1.0, %v1637_v13 }
 0x26c   : > { %1650 = vrcp.f32 %v773_v14 }
 0x26d   : > { %1652 = vrcp.f32 %v775_v15 }
 0x273   : > { %v1639_v16 = vpop.eup %1638 }
 0x274   : > { %v1641_v17 = vpop.eup %1640  ;;  %v792_v28 = vmul.f32 %v1639_v16, %v2028_v42 }
 0x275   : > { %v1643_v18 = vpop.eup %1642  ;;  %v794_v31 = vmul.f32 %v1641_v17, %v2030_v43  ;;  %v1386_v43 = vld [vmem:[%s2101_s6] ss:$0 sm:$0xff] }
 0x276   : > { %v1645_v19 = vpop.eup %1644  ;;  %v793_v25 = vmul.f32 %v1643_v18, %v695_v48 }
 0x277   : > { %v1647_v20 = vpop.eup %1646  ;;  %v795_v29 = vmul.f32 %v1645_v19, %v738_v49 }
 0x278   : > { %v1649_v21 = vpop.eup %1648  ;;  %v796_v23 = vmul.f32 %v1647_v20, %v697_v54 }
 0x279   : > { %v1651_v22 = vpop.eup %1650  ;;  %v798_v26 = vmul.f32 %v1649_v21, %v740_v55 }
 0x27a   : > { %v1653_v24 = vpop.eup %1652  ;;  %v797_v27 = vmul.f32 %v1651_v22, %v699_v59  ;;  %v802_v33 = vpack.c.bf16 %v796_v23, %v792_v28 }
 0x27b   : > { %v799_v30 = vmul.f32 %v1653_v24, %v742_v60  ;;  %v804_v35 = vpack.c.bf16 %v798_v26, %v794_v31 }
 0x27c   : > { %v803_v32 = vpack.c.bf16 %v797_v27, %v793_v25 }
 0x27d   : > { %v805_v34 = vpack.c.bf16 %v799_v30, %v795_v29 }
 0x27e   : > { %1094 = vmatprep.mubr.bf16.mxu0 %v803_v32 }
 0x27f   : > { %1135 = vmatprep.mubr.bf16.mxu1 %v805_v34  ;;  %1095 = vmatmul.mubr.bf16.vlgmr.msra.gmra.mxu0 %v802_v33 }
 0x280   : > { %1136 = vmatmul.mubr.bf16.vlgmr.msra.gmra.mxu1 %v804_v35 }
 0x33f   : > { %v1417_v36 = vpop.f32.mrf.mxu0 }
 0x340   : > { %v1439_v37 = vpop.f32.mrf.mxu1 }
 0x341   : > { %v1418_v38 = vpop.f32.mrf.mxu0 }
 0x342   : > { %v1419_v39 = vadd.f32 %v1418_v38, %v1417_v36  ;;  %v1440_v40 = vpop.f32.mrf.mxu1 }
 0x343   : > { %v1441_v41 = vadd.f32 %v1440_v40, %v1439_v37  ;;  %v1420_v42 = vpop.f32.mrf.mxu0 }
 0x344   : > { %v1442_v44 = vpop.f32.mrf.mxu1 }
 0x345   : > { %v1138_v45 = vadd.f32 %v1441_v41, %v1419_v39  ;;  %v1421_v46 = vpop.f32.mrf.mxu0 }
 0x346   : > { %v1422_v47 = vadd.f32 %v1421_v46, %v1420_v42  ;;  %v1443_v48 = vpop.f32.mrf.mxu1 }
 0x347   : > { %v1160_v49 = vadd.f32 %v1386_v43, %v1138_v45  ;;  %v1444_v50 = vadd.f32 %v1443_v48, %v1442_v44 }
 0x349   : > { %1162 = vst [vmem:[%s367_s20] sm:$0xff] %v1160_v49  ;;  %v1141_v51 = vadd.f32 %v1444_v50, %v1422_v47 }
 0x34b   : > { %v1161_v52 = vadd.f32 %v1386_v43, %v1141_v51 }
 0x34d   : > { %1163 = vst [vmem:[%s367_s20 + $0x8] sm:$0xff] %v1161_v52 }
 0x34e   : > { %1747 = shalt.err (!%p1744_p5)
}
 0x34f   : > { %s1748_s11 = scalar_lea.hbm %s2047_s17, 256  ;;  %s1752_s10 = scalar_lea.hbm %s2102_s7, 512 }
 0x350   : > { %p1749_p10 = scmp.ne.s32.totalorder %s2047_s17, %s1748_s11  ;;  %p1753_p6 = scmp.lt.s32.totalorder %s2047_s17, %s2102_s7 }
 0x351   : > { %p1754_p12 = scmp.lt.s32.totalorder %s1752_s10, %s1748_s11 }
 0x352   : > { %p1750_p1 = pnand %p1749_p10, %p1968_p7 }
 0x353   : > { %p1755_p3 = por %p1754_p12, %p1753_p6 }
 0x354   : > { %p1751_p4 = pneg %p1750_p1 }
 0x356   : > { %p1756_p8 = pnand %p1755_p3, %p1751_p4 }
 0x358   : > { %1759 = shalt.err (!%p1756_p8)
}
 0x359   : > { %s1831_s18 = smov 128   ;;  %s1832_s8 = smov 8  }
 0x35a   : > { %1455 = dma.vmem_to_hbm [thread:$0]  (%p1968_p7), %s2042_s23, 256, %s2047_s17, %s1165_s19, %s1831_s18, %s1831_s18, %s1832_s8  }
 0x35b PF: > { %s1193_s14 = sand.u32 1, %s1798_s24   ;;  %p2122_p9 = scmp.ne.s32.totalorder %s2112_s12, 0 }
 0x35c   : > { %p2123_p11 = scmp.ge.s32.totalorder %s1818_s29, 2  ;;  %s1194_s3 = scalar_lea.sflag [#allocation6], %s1193_s14 }
 0x35e   : > { %p1469_p2 = pnand %p2123_p11, %p2122_p9 }
 0x360   : > { %p1470_p13 = pneg %p1469_p2 }
 0x362   : > { %1793 = dma.done.wait (%p1470_p13), %s1194_s3, 256  }
 0x363   : > { %1795 = vsyncadd (%p1470_p13), %s1194_s3, 4294967040  ;;  %s24_s29 = sadd.s32 1, %s1818_s29   ;;  %s2124_s21 = sld [smem:[#allocation14_spill]] }
 0x364   : > { %p21_p0 = scmp.ge.s32.totalorder %s24_s29, 4   ;;  %s2125_s24 = smov %s1802_s25 }
 0x365   : > { %s2126_s25 = smov %s1806_s26  ;;  %s2127_s26 = smov %s1977_s30 }
 0x366   : > { %s2128_s27 = smov %s1814_s28  ;;  %23 = sbr.rel (!%p21_p0) target bundleno = 10 (0xa), region = 114 }
 0x369   : > { %s2129_s28 = smov %s2124_s21 }
 0x36b   :  { %1199 = vsyncpa [#allocation5], 1 }
 0x36c   :  { %1201 = vsyncpa [#allocation5 + $0x1], 1 }
 0x36d   :  { %1202 = vsyncpa [#allocation8], 1 }
 0x36e   :  { %1203 = vsyncpa [#allocation6], 1 }
 0x36f   :  { %1205 = vsyncpa [#allocation6 + $0x1], 1 }

</bundles_post_ra>
